<compile_context>
chip_gen: v7x
topology: tpu7x:2x2x1
jax: 0.10.0
libtpu: 0.0.40
codegen_flags: <defaults>
</compile_context>

<pallas_src>
import jax
import jax.numpy as jnp
from jax.experimental import pallas as pl
from jax.experimental.pallas import tpu as pltpu

VIRTUAL_BOND_FEATURE_PLACEHOLDER = -1


def _round_up(x, m):
    return -(-x // m) * m


def bond_embedding_kernel(x_ref, w_ref, b_ref, vemb_ref, out_ref):
    x = x_ref[...]                                             # (tm, d_k) f32
    # Linear projection on the MXU with f32 accumulation.  The flag column is
    # backed by a zero row of W, so it does not perturb the projection.
    h = jnp.dot(x, w_ref[...], preferred_element_type=jnp.float32)
    h = h + b_ref[...]                                         # (tm, d_g) + (1, d_g)
    # Virtual-bond flag lives in the last (zero-weight) K-pad column.
    flag_col = x.shape[-1] - 1
    is_virtual = x[:, flag_col:flag_col + 1] > 0.5             # (tm, 1) bool
    # Vectorized select (VPU/XLU filler under the DMA-bound critical path).
    h = jnp.where(is_virtual, vemb_ref[...], h)                # (tm, d_g)
    # TODO(synk): training-mode dropout (stochastic mask via pltpu.prng_*) not
    # implemented; eval-mode Dropout is the identity, which is what we emit.
    out_ref[...] = h.astype(out_ref.dtype)


def bond_embedding(edge_feats, indicators, w_t, bias, virtual_emb, *, tm=None,
                   out_dtype=jnp.float32, vmem_budget_bytes=8 * 1024 * 1024):
    """edge_feats: (N, d_bond) f32, indicators: (N,) int, w_t: (d_bond, d_g),
    bias: (d_g,), virtual_emb: (1, d_g) -> (N, d_g) in out_dtype."""
    n, d_bond = edge_feats.shape
    d_g = w_t.shape[1]

    # --- fold the virtual-bond flag into the K padding (single fused pad/concat;
    #     d_k = round_up(d_bond + 1, 8) keeps clean f32 sublane tiles) ---------
    d_k = _round_up(d_bond + 1, 8)
    flag = (indicators == VIRTUAL_BOND_FEATURE_PLACEHOLDER).astype(jnp.float32)
    x = jnp.concatenate(
        [edge_feats.astype(jnp.float32),
         jnp.zeros((n, d_k - d_bond - 1), jnp.float32),
         flag[:, None]],
        axis=1)                                                # (n, d_k)
    w = jnp.pad(w_t.astype(jnp.float32), ((0, d_k - d_bond), (0, 0)))  # (d_k, d_g)
    b2d = bias.astype(jnp.float32).reshape(1, d_g)
    v2d = virtual_emb.astype(jnp.float32).reshape(1, d_g)

    # --- row tile: lane-padding-aware double-buffered VMEM accounting, capped
    #     at 1024 rows, and shrunk so the grid has >= MIN_STEPS steps ---------
    MIN_STEPS = 4          # keeps DMA pipelining + v7x megacore sharding busy
    LANE = 128
    in_row_bytes = _round_up(d_k, LANE) * 4
    out_row_bytes = _round_up(d_g, LANE) * jnp.dtype(out_dtype).itemsize
    per_row_bytes = 2 * (in_row_bytes + out_row_bytes)         # double-buffered in+out
    if tm is None:
        tm = min(1024, max(8, (vmem_budget_bytes // per_row_bytes) // 8 * 8))
        tm = min(tm, max(8, _round_up(pl.cdiv(n, MIN_STEPS), 8)))
    tm = max(8, (int(tm) // 8) * 8)

    grid = (pl.cdiv(n, tm),)   # ragged trailing block is masked by Pallas

    out = pl.pallas_call(
        bond_embedding_kernel,
        out_shape=jax.ShapeDtypeStruct((n, d_g), out_dtype),
        grid=grid,
        in_specs=[
            pl.BlockSpec((tm, d_k), lambda i: (i, 0)),    # edge rows (+flag col): tiled
            pl.BlockSpec((d_k, d_g), lambda i: (0, 0)),   # weight: VMEM-resident
            pl.BlockSpec((1, d_g), lambda i: (0, 0)),     # bias: VMEM-resident
            pl.BlockSpec((1, d_g), lambda i: (0, 0)),     # virtual emb: VMEM-resident
        ],
        out_specs=pl.BlockSpec((tm, d_g), lambda i: (i, 0)),
        compiler_params=pltpu.CompilerParams(
            dimension_semantics=("parallel",),            # shard rows across TCs (v7x)
        ),
    )(x, w, b2d, v2d)
    return out


if __name__ == "__main__":
    key = jax.random.PRNGKey(0)

    def make_case(case_key, n, d_bond, d_g):
        k_x, k_w, k_b, k_v = jax.random.split(case_key, 4)
        edge_feats = jax.random.normal(k_x, (n, d_bond), dtype=jnp.float32)
        # Every 5th edge is a virtual bond.
        indicators = jnp.where(
            jnp.arange(n) % 5 == 0,
            jnp.int32(VIRTUAL_BOND_FEATURE_PLACEHOLDER),
            jnp.int32(0),
        )
        # torch layouts: Linear.weight (out, in), Embedding(1, d_g).weight (1, d_g)
        w = jax.random.normal(k_w, (d_g, d_bond), dtype=jnp.float32) * 0.1
        bias = jax.random.normal(k_b, (d_g,), dtype=jnp.float32) * 0.1
        virtual_emb = jax.random.normal(k_v, (1, d_g), dtype=jnp.float32)
        return edge_feats, indicators, w.T, bias, virtual_emb

    def reference(edge_feats, indicators, w_t, bias, virtual_emb):
        ref = jnp.matmul(edge_feats, w_t,
                         precision=jax.lax.Precision.HIGHEST) + bias[None, :]
        return jnp.where(
            (indicators == VIRTUAL_BOND_FEATURE_PLACEHOLDER)[:, None],
            virtual_emb, ref,
        )

    k1, k2, k3, k4 = jax.random.split(key, 4)

    # Case 1: auto tile, ragged N, lane-native d_g (multi-step grid, masked tail).
    args1 = make_case(k1, 300, 14, 128)
    out1 = jax.block_until_ready(bond_embedding(*args1))
    assert out1.shape == (300, 128)
    assert jnp.allclose(out1, reference(*args1), atol=1e-5, rtol=1e-5)

    # Case 2: narrow d_g (< 128; full-dim blocks, no feature padding), tiny N.
    args2 = make_case(k2, 16, 14, 32)
    out2 = jax.block_until_ready(bond_embedding(*args2))
    assert out2.shape == (16, 32)
    assert jnp.allclose(out2, reference(*args2), atol=1e-5, rtol=1e-5)

    # Case 3: explicit row tile that does not divide N (exercises masked tail block).
    args3 = make_case(k3, 300, 14, 128)
    out3 = jax.block_until_ready(bond_embedding(*args3, tm=128))
    assert out3.shape == (300, 128)
    assert jnp.allclose(out3, reference(*args3), atol=1e-5, rtol=1e-5)

    # Case 4: bf16 output path (halved HBM write stream), looser tolerance.
    args4 = make_case(k4, 257, 14, 256)
    out4 = jax.block_until_ready(bond_embedding(*args4, out_dtype=jnp.bfloat16))
    assert out4.shape == (257, 256) and out4.dtype == jnp.bfloat16
    assert jnp.allclose(out4.astype(jnp.float32), reference(*args4),
                        atol=3e-2, rtol=3e-2)

    print("KERNEL_OK")
</pallas_src>

<mosaic_0001>
module attributes {stable_mosaic.version = 11 : i64} {
  func.func @bond_embedding_kernel(%arg0: i32, %arg1: memref<80x16xf32, #tpu.memory_space<vmem>>, %arg2: memref<16x128xf32, #tpu.memory_space<vmem>>, %arg3: memref<1x128xf32, #tpu.memory_space<vmem>>, %arg4: memref<1x128xf32, #tpu.memory_space<vmem>>, %arg5: memref<80x128xf32, #tpu.memory_space<vmem>>) attributes {dimension_semantics = [#tpu.dimension_semantics<parallel>], iteration_bounds = array<i64: 4>, scalar_prefetch = 0 : i64, scratch_operands = 0 : i64, tpu.core_type = #tpu.core_type<tc>, window_params = [{transform_indices = @transform_0, window_bounds = array<i64: 80, 16>}, {pipeline_mode = #tpu.pipeline_mode<synchronous>, transform_indices = @transform_1, window_bounds = array<i64: 16, 128>}, {pipeline_mode = #tpu.pipeline_mode<synchronous>, transform_indices = @transform_2, window_bounds = array<i64: 1, 128>}, {pipeline_mode = #tpu.pipeline_mode<synchronous>, transform_indices = @transform_3, window_bounds = array<i64: 1, 128>}, {transform_indices = @transform_4, window_bounds = array<i64: 80, 128>}]} {
    %c0 = arith.constant 0 : index
    %c0_0 = arith.constant 0 : index
    %0 = vector.load %arg1[%c0, %c0_0] : memref<80x16xf32, #tpu.memory_space<vmem>>, vector<80x16xf32>
    %c0_1 = arith.constant 0 : index
    %c0_2 = arith.constant 0 : index
    %1 = vector.load %arg2[%c0_1, %c0_2] : memref<16x128xf32, #tpu.memory_space<vmem>>, vector<16x128xf32>
    %cst = arith.constant dense<0.000000e+00> : vector<80x128xf32>
    %2 = tpu.matmul %0, %1, %cst {dimension_numbers = #tpu.dot_dimension_numbers<[1], [0], [0], [1], [0, 0, 1, 1], [], []>} : vector<80x16xf32>, vector<16x128xf32>, vector<80x128xf32> -> vector<80x128xf32>
    %c0_3 = arith.constant 0 : index
    %c0_4 = arith.constant 0 : index
    %3 = vector.load %arg3[%c0_3, %c0_4] : memref<1x128xf32, #tpu.memory_space<vmem>>, vector<1x128xf32>
    %4 = vector.broadcast %3 : vector<1x128xf32> to vector<80x128xf32>
    %5 = arith.addf %2, %4 : vector<80x128xf32>
    %6 = vector.extract_strided_slice %0 {offsets = [0, 15], sizes = [80, 1], strides = [1, 1]} : vector<80x16xf32> to vector<80x1xf32>
    %cst_5 = arith.constant 5.000000e-01 : f32
    %7 = vector.broadcast %cst_5 : f32 to vector<80x1xf32>
    %8 = arith.cmpf ogt, %6, %7 : vector<80x1xf32>
    %c0_6 = arith.constant 0 : index
    %c0_7 = arith.constant 0 : index
    %9 = vector.load %arg4[%c0_6, %c0_7] : memref<1x128xf32, #tpu.memory_space<vmem>>, vector<1x128xf32>
    %10 = vector.shape_cast %8 : vector<80x1xi1> to vector<80x1xi1>
    %11 = vector.broadcast %10 : vector<80x1xi1> to vector<80x128xi1>
    %12 = vector.shape_cast %9 : vector<1x128xf32> to vector<1x128xf32>
    %13 = vector.broadcast %12 : vector<1x128xf32> to vector<80x128xf32>
    %14 = arith.select %11, %13, %5 : vector<80x128xi1>, vector<80x128xf32>
    %c0_8 = arith.constant 0 : index
    %c0_9 = arith.constant 0 : index
    %15 = vector.load %arg5[%c0_8, %c0_9] : memref<80x128xf32, #tpu.memory_space<vmem>>, vector<80x128xf32>
    tpu.vector_store %arg5[%c0_8, %c0_9], %14 {strides = array<i32>} : memref<80x128xf32, #tpu.memory_space<vmem>>, vector<80x128xf32>,
    return
  }
  func.func @transform_0(%arg0: i32) -> (i32, i32) {
    %c0_i32 = arith.constant 0 : i32
    %c0_i32_0 = arith.constant 0 : i32
    return %arg0, %c0_i32 : i32, i32
  }
  func.func @transform_1(%arg0: i32) -> (i32, i32) {
    %c0_i32 = arith.constant 0 : i32
    %c0_i32_0 = arith.constant 0 : i32
    %c0_i32_1 = arith.constant 0 : i32
    return %c0_i32, %c0_i32_0 : i32, i32
  }
  func.func @transform_2(%arg0: i32) -> (i32, i32) {
    %c0_i32 = arith.constant 0 : i32
    %c0_i32_0 = arith.constant 0 : i32
    %c0_i32_1 = arith.constant 0 : i32
    return %c0_i32, %c0_i32_0 : i32, i32
  }
  func.func @transform_3(%arg0: i32) -> (i32, i32) {
    %c0_i32 = arith.constant 0 : i32
    %c0_i32_0 = arith.constant 0 : i32
    %c0_i32_1 = arith.constant 0 : i32
    return %c0_i32, %c0_i32_0 : i32, i32
  }
  func.func @transform_4(%arg0: i32) -> (i32, i32) {
    %c0_i32 = arith.constant 0 : i32
    %c0_i32_0 = arith.constant 0 : i32
    return %arg0, %c0_i32 : i32, i32
  }
}

</mosaic_0001>

<bundles_post_ra>
// kernel: tpu_custom_call.1
= control target key start
LH: loop header
LB: loop body
LE: loop exit
PB: predicated region body
PF: predicated region fallthrough
CT: control target
= control target key end

     0   :  { %9 = vsyncpa [#allocation3], 0  ;;  %s914_s0 = inlined_call_operand.vmem [shape: f32[300,16], index: 0, kind: input, shape index: {}]   ;;  %s915_s1 = inlined_call_operand.vmem [shape: f32[16,128], index: 1, kind: input, shape index: {}]   ;;  %s916_s2 = inlined_call_operand.vmem [shape: f32[1,128], index: 2, kind: input, shape index: {}]   ;;  %s917_s3 = inlined_call_operand.vmem [shape: f32[1,128], index: 3, kind: input, shape index: {}]   ;;  %s918_s4 = inlined_call_operand.hbm [shape: f32[300,128], index: 4, kind: output, shape index: {}]  }
   0x1   :  { %11 = vsyncpa [#allocation3 + $0x1], 0  ;;  %s758_s15 = smov 0   ;;  %s760_s16 = smov 0  }
   0x2   :  { %s762_s17 = smov 0   ;;  %s764_s18 = smov 0  }
   0x3 LB: > { %s779_s19 = sadd.s32 4294967295, %s726_s18   ;;  %s557_s20 = sadd.s32 4294967294, %s726_s18   ;;  %s726_s18 = sphi %s764_s18, %s924_s18   ;;  %s722_s17 = sphi %s762_s17, %s923_s17   ;;  %s718_s16 = sphi %s760_s16, %s922_s16   ;;  %s714_s15 = sphi %s758_s15, %s921_s15  }
   0x4   : > { %s783_s21 = sadd.s32 1, %s726_s18   ;;  %s113_s22 = sadd.s32 1, %s722_s17 }
   0x5   : > { %s110_s23 = ssub.s32 %s726_s18, %s783_s21  ;;  %p123_p0 = scmp.ne.s32.totalorder %s722_s17, %s718_s16 }
   0x6   : > { %p111_p1 = scmp.eq.s32.totalorder %s110_s23, 0  ;;  %p124_p2 = scmp.eq.s32.totalorder %s779_s19, 3 }
   0x7   : > { %p129_p3 = scmp.ne.s32.totalorder %s718_s16, %s714_s15  ;;  %p130_p4 = scmp.eq.s32.totalorder %s557_s20, 3 }
   0x8   : > { %s794_s24 = scalar_select %p111_p1, %s722_s17, %s113_s22  }
   0x9   : > { %p796_p5 = por %p124_p2, %p123_p0  ;;  %p800_p6 = por %p130_p4, %p129_p3 }
   0xa   : > { %p560_p7 = scmp.ge.s32.totalorder %s726_s18, 1  ;;  %p174_p8 = scmp.lt.s32.totalorder %s726_s18, 5 }
   0xc   : > { %p175_p9 = pnand %p560_p7, %p174_p8 }
   0xd   : > { %v233_v0 = vld [vmem:[%s915_s1] sm:$0xff] (!%p175_p9)  ;;  %v234_v1 = vld [vmem:[%s915_s1 + $0x8] sm:$0xff] (!%p175_p9)  ;;  %s813_s5 = smul.u32 (!%p175_p9), 10, %s779_s19  ;;  %v728_v3 = vmov (!%p175_p9), 15   ;;  %vm242_vm0 = vcmask (!%p175_p9), 130048   ;;  %v729_v11 = vmov (!%p175_p9), 0  }
   0xe   : > { %178 = sbr.rel (%p175_p9) target bundleno = 280 (0x118), region = 36  ;;  %v613_v2 = vpack.c.bf16 (!%p175_p9), %v234_v1, %v233_v0  ;;  %663 = vset.pattern.permute.xlu1 (!%p175_p9), %v728_v3  ;;  %662 = vset.pattern.permute.xlu0 (!%p175_p9), %v728_v3  ;;  %s201_s11 = sand.u32 (!%p175_p9), 1, %s718_s16   ;;  %v562_v33 = vld [vmem:[%s916_s2] ss:$0 sm:$0xff] (!%p175_p9) }
   0xf   : > { %p209_p10 = scmp.lt.s32.totalorder (!%p175_p9), %s813_s5, 37  ;;  %s619_s12 = smul.u32 (!%p175_p9), 80, %s201_s11  ;;  %v573_v35 = vld [vmem:[%s917_s3] ss:$0 sm:$0xff] (!%p175_p9) }
  0x10   : > { %614 = vmatprep.subr.bf16.mxu0 (!%p175_p9), %v613_v2  ;;  %617 = vmatprep.subr.bf16.mxu1 (!%p175_p9), %v613_v2  ;;  %s853_s27 = scalar_lea.sflag (!%p175_p9), [#allocation3], %s201_s11 }
  0x11   : > { %616 = vmatpush3.bf16.msra.mxu0 (!%p175_p9), %v613_v2  ;;  %618 = vmatpush3.bf16.msra.mxu1 (!%p175_p9), %v613_v2  ;;  %s839_s23 = scalar_lea.vmem (!%p175_p9), [#allocation2], %s619_s12 }
  0x15   : > { %s210_s6 = scalar_select %p209_p10, %s813_s5, 37 }
  0x16   : > { %s484_s28 = ssub.s32 (%p796_p5), 38, %s813_s5 }
  0x17   : > { %s561_s7 = sshll.u32 %s210_s6, 3  ;;  %p485_p11 = scmp.lt.s32.totalorder (%p796_p5), %s484_s28, 10 }
  0x18   : > { %s212_s10 = scalar_lea.vmem %s914_s0, %s561_s7 }
  0x19   : > { %v223_v4 = vld [vmem:[%s212_s10] sm:$0xff]  ;;  %v229_v5 = vld [vmem:[%s212_s10 + $0x30] sm:$0xff]  ;;  %v224_v6 = vld [vmem:[%s212_s10 + $0x8] sm:$0xff] }
  0x1a   : > { %598 = vmatprep.mubr.msk.f32.mxu0 %vm242_vm0, %v223_v4  ;;  %607 = vmatprep.mubr.msk.f32.mxu1 %vm242_vm0, %v229_v5  ;;  %v230_v7 = vld [vmem:[%s212_s10 + $0x38] sm:$0xff]  ;;  %v225_v8 = vld [vmem:[%s212_s10 + $0x10] sm:$0xff]  ;;  %v231_v9 = vld [vmem:[%s212_s10 + $0x40] sm:$0xff]  ;;  %vm388_vm1 = vcmp.gt.f32.partialorder %v223_v4, 0.5  ;;  %vm389_vm3 = vcmp.gt.f32.partialorder %v224_v6, 0.5  ;;  %vm394_vm7 = vcmp.gt.f32.partialorder %v229_v5, 0.5 }
  0x1b   : > { %599 = vmatmul.mubr.msk.f32.vlgmr.msra.gmra.mrb[0].mxu0 %vm242_vm0, %v224_v6  ;;  %608 = vmatmul.mubr.msk.f32.vlgmr.msra.gmra.mrb[0].mxu1 %vm242_vm0, %v230_v7  ;;  %v226_v10 = vld [vmem:[%s212_s10 + $0x18] sm:$0xff]  ;;  %vm390_vm2 = vcmp.gt.f32.partialorder %v225_v8, 0.5  ;;  %v399_v12 = vsel %vm388_vm1, 1, %v729_v11  ;;  %v232_v13 = vld [vmem:[%s212_s10 + $0x48] sm:$0xff]  ;;  %v227_v15 = vld [vmem:[%s212_s10 + $0x20] sm:$0xff]  ;;  %v400_v18 = vsel %vm389_vm3, 1, %v729_v11 }
  0x1c   : > { %601 = vmatprep.mubr.msk.f32.mxu0 %vm242_vm0, %v225_v8  ;;  %610 = vmatprep.mubr.msk.f32.mxu1 %vm242_vm0, %v231_v9  ;;  %v401_v14 = vsel %vm390_vm2, 1, %v729_v11  ;;  %vm391_vm4 = vcmp.gt.f32.partialorder %v226_v10, 0.5  ;;  %v228_v16 = vld [vmem:[%s212_s10 + $0x28] sm:$0xff]  ;;  %vm392_vm6 = vcmp.gt.f32.partialorder %v227_v15, 0.5  ;;  %vm395_vm8 = vcmp.gt.f32.partialorder %v230_v7, 0.5 }
  0x1d   : > { %416 = vperm.xlu1 %663, %v401_v14   ;;  %410 = vperm.xlu0 %662, %v399_v12   ;;  %v402_v17 = vsel %vm391_vm4, 1, %v729_v11  ;;  %vm393_vm5 = vcmp.gt.f32.partialorder %v228_v16, 0.5  ;;  %v403_v20 = vsel %vm392_vm6, 1, %v729_v11  ;;  %v406_v21 = vsel %vm395_vm8, 1, %v729_v11 }
  0x1e   : > { %v404_v19 = vsel %vm393_vm5, 1, %v729_v11  ;;  %v405_v22 = vsel %vm394_vm7, 1, %v729_v11  ;;  %vm397_vm9 = vcmp.gt.f32.partialorder %v232_v13, 0.5  ;;  %vm396_vm10 = vcmp.gt.f32.partialorder %v231_v9, 0.5 }
  0x1f   : > { %602 = vmatmul.mubr.msk.f32.gmra.mrb[2].mxu0 %vm242_vm0, %v226_v10  ;;  %611 = vmatmul.mubr.msk.f32.gmra.mrb[2].mxu1 %vm242_vm0, %v232_v13  ;;  %v408_v23 = vsel %vm397_vm9, 1, %v729_v11  ;;  %v407_v24 = vsel %vm396_vm10, 1, %v729_v11 }
  0x20   : > { %604 = vmatprep.mubr.msk.f32.mxu0 %vm242_vm0, %v227_v15 }
  0x21   : > { %419 = vperm.xlu1 %663, %v402_v17   ;;  %413 = vperm.xlu0 %662, %v400_v18  }
  0x23   : > { %605 = vmatmul.mubr.msk.f32.gmra.mrb[4].mxu0 %vm242_vm0, %v228_v16 }
  0x25   : > { %425 = vperm.xlu1 %663, %v404_v19   ;;  %422 = vperm.xlu0 %662, %v403_v20  }
  0x29   : > { %431 = vperm.xlu1 %663, %v406_v21   ;;  %428 = vperm.xlu0 %662, %v405_v22  }
  0x2d   : > { %437 = vperm.xlu1 %663, %v408_v23   ;;  %434 = vperm.xlu0 %662, %v407_v24  }
  0x9c   : > { %v417_v25 = vpop.permute.xlu1 %416  ;;  %v411_v26 = vpop.permute.xlu0 %410 }
  0x9d   : > { %vm439_vm13 = vcmp.eq.s32.totalorder %v411_v26, 1  ;;  %vm441_vm1 = vcmp.eq.s32.totalorder %v417_v25, 1 }
  0xa0   : > { %v420_v27 = vpop.permute.xlu1 %419  ;;  %v414_v28 = vpop.permute.xlu0 %413 }
  0xa1   : > { %vm440_vm11 = vcmp.eq.s32.totalorder %v414_v28, 1  ;;  %vm442_vm15 = vcmp.eq.s32.totalorder %v420_v27, 1 }
  0xa4   : > { %v426_v29 = vpop.permute.xlu1 %425  ;;  %v423_v30 = vpop.permute.xlu0 %422 }
  0xa5   : > { %vm444_vm3 = vcmp.eq.s32.totalorder %v426_v29, 1  ;;  %vm443_vm4 = vcmp.eq.s32.totalorder %v423_v30, 1 }
  0xa8   : > { %v432_v31 = vpop.permute.xlu1 %431  ;;  %v429_v32 = vpop.permute.xlu0 %428 }
  0xa9   : > { %vm446_vm12 = vcmp.eq.s32.totalorder %v432_v31, 1  ;;  %vm445_vm14 = vcmp.eq.s32.totalorder %v429_v32, 1 }
  0xac   : > { %v438_v43 = vpop.permute.xlu1 %437  ;;  %v435_v44 = vpop.permute.xlu0 %434 }
  0xad   : > { %vm448_vm0 = vcmp.eq.s32.totalorder %v438_v43, 1  ;;  %vm447_vm2 = vcmp.eq.s32.totalorder %v435_v44, 1 }
  0xee   : > { %v600_v34 = vpop.f32.mrb[0].mxu0  ;;  %v609_v36 = vpop.f32.mrb[0].mxu1 }
  0xef   : > { %v345_v37 = vadd.f32 %v600_v34, %v562_v33  ;;  %v375_v38 = vadd.f32 %v609_v36, %v562_v33  ;;  %v339_v39 = vpop.f32.mrb[1].mxu0  ;;  %v369_v40 = vpop.f32.mrb[1].mxu1 }
  0xf0   : > { %v340_v41 = vadd.f32 %v562_v33, %v339_v39  ;;  %v370_v42 = vadd.f32 %v562_v33, %v369_v40 }
  0xf1   : > { %v456_v45 = vsel %vm440_vm11, %v573_v35, %v345_v37  ;;  %v462_v46 = vsel %vm446_vm12, %v573_v35, %v375_v38 }
  0xf2   : > { %466 = vst [vmem:[%s839_s23 + $0x8] sm:$0xff] %v456_v45  ;;  %472 = vst [vmem:[%s839_s23 + $0x38] sm:$0xff] %v462_v46  ;;  %v455_v47 = vsel %vm439_vm13, %v573_v35, %v340_v41  ;;  %v461_v48 = vsel %vm445_vm14, %v573_v35, %v370_v42  ;;  %v603_v49 = vpop.f32.mrb[2].mxu0  ;;  %v612_v50 = vpop.f32.mrb[2].mxu1 }
  0xf3   : > { %465 = vst [vmem:[%s839_s23] sm:$0xff] %v455_v47  ;;  %471 = vst [vmem:[%s839_s23 + $0x30] sm:$0xff] %v461_v48  ;;  %v355_v51 = vadd.f32 %v603_v49, %v562_v33  ;;  %v385_v52 = vadd.f32 %v612_v50, %v562_v33  ;;  %v349_v53 = vpop.f32.mrb[3].mxu0  ;;  %v379_v54 = vpop.f32.mrb[3].mxu1 }
  0xf4   : > { %v350_v55 = vadd.f32 %v562_v33, %v349_v53  ;;  %v380_v56 = vadd.f32 %v562_v33, %v379_v54 }
  0xf5   : > { %v458_v57 = vsel %vm442_vm15, %v573_v35, %v355_v51  ;;  %v464_v58 = vsel %vm448_vm0, %v573_v35, %v385_v52  ;;  %482 = sbr.rel (!%p796_p5) target bundleno = 280 (0x118), region = 40 }
  0xf6   : > { %468 = vst [vmem:[%s839_s23 + $0x18] sm:$0xff] %v458_v57  ;;  %474 = vst [vmem:[%s839_s23 + $0x48] sm:$0xff] %v464_v58  ;;  %v457_v59 = vsel %vm441_vm1, %v573_v35, %v350_v55  ;;  %v463_v60 = vsel %vm447_vm2, %v573_v35, %v380_v56  ;;  %v606_v61 = vpop.f32.mrb[4].mxu0 }
  0xf7   : > { %467 = vst [vmem:[%s839_s23 + $0x10] sm:$0xff] %v457_v59  ;;  %473 = vst [vmem:[%s839_s23 + $0x40] sm:$0xff] %v463_v60  ;;  %v365_v62 = vadd.f32 %v606_v61, %v562_v33  ;;  %v359_v63 = vpop.f32.mrb[5].mxu0 }
  0xf8   : > { %v360_v0 = vadd.f32 %v562_v33, %v359_v63 }
  0xf9   : > { %v460_v1 = vsel %vm444_vm3, %v573_v35, %v365_v62 }
  0xfa   : > { %470 = vst [vmem:[%s839_s23 + $0x28] sm:$0xff] %v460_v1  ;;  %v459_v2 = vsel %vm443_vm4, %v573_v35, %v360_v0 }
  0xfb   : > { %469 = vst [vmem:[%s839_s23 + $0x20] sm:$0xff] %v459_v2 }
  0xfc   : > { %s926_s28 = smov (!%p485_p11, %s484_s28), 10 }
  0xfd   : > { %s858_s29 = sshll.u32 %s926_s28, 7 }
  0xfe   : > { %s489_s30 = ssub.s32 1280, %s858_s29 }
  0xff   : > { %490 = vsyncadd %s853_s27, %s489_s30  ;;  %p575_p12 = scmp.ne.s32.totalorder %s858_s29, 0  ;;  %s581_s6 = smul.u32 1280, %s779_s19 }
 0x100   : > { %s495_s7 = sshll.u32 %s839_s23, 4  ;;  %s730_s10 = smov [#allocation2]   ;;  %s870_s7 = int_to_ptr.vmem [resolvable:$true] %s495_s7 }
 0x101   : > { %s868_s9 = scalar_lea.hbm %s918_s4, %s581_s6  ;;  %s664_s5 = scalar_lea.vmem %s870_s7, %s858_s29 }
 0x102   : > { %p665_p13 = scmp.ne.s32.totalorder %s870_s7, %s664_s5  ;;  %s668_s11 = sshll.u32 %s730_s10, 4  ;;  %s669_s11 = int_to_ptr.vmem [resolvable:$false] %s668_s11 }
 0x103   : > { %s670_s19 = scalar_lea.vmem %s669_s11, 2560  ;;  %p671_p2 = scmp.lt.s32.totalorder %s870_s7, %s669_s11 }
 0x104   : > { %p666_p0 = pnand %p665_p13, %p575_p12  ;;  %p672_p3 = scmp.lt.s32.totalorder %s670_s19, %s664_s5 }
 0x106   : > { %p667_p1 = pneg %p666_p0  ;;  %p673_p4 = por %p672_p3, %p671_p2 }
 0x108   : > { %p674_p5 = pnand %p673_p4, %p667_p1 }
 0x10a   : > { %677 = shalt.err (!%p674_p5)
}
 0x10b   : > { %s678_s12 = scalar_lea.hbm %s868_s9, %s858_s29  ;;  %s682_s20 = scalar_lea.hbm %s918_s4, 4864 }
 0x10c   : > { %p679_p7 = scmp.ne.s32.totalorder %s868_s9, %s678_s12  ;;  %p683_p10 = scmp.lt.u32.totalorder %s868_s9, %s918_s4 }
 0x10d   : > { %p684_p11 = scmp.lt.u32.totalorder %s682_s20, %s678_s12  ;;  %p686_p0 = scmp.lt.u32.totalorder %s678_s12, %s868_s9 }
 0x10e   : > { %p680_p8 = pnand %p679_p7, %p575_p12 }
 0x10f   : > { %p685_p13 = por %p684_p11, %p683_p10 }
 0x110   : > { %p681_p9 = pneg %p680_p8 }
 0x111   : > { %p687_p1 = por %p686_p0, %p685_p13 }
 0x113   : > { %p688_p2 = pnand %p687_p1, %p681_p9 }
 0x115   : > { %691 = shalt.err (!%p688_p2)
}
 0x116   : > { %s731_s28 = smov 128   ;;  %s732_s30 = smov 8  }
 0x117   : > { %501 = dma.vmem_to_hbm [thread:$0]  (%p575_p12), %s870_s7, %s858_s29, %s868_s9, %s853_s27, %s731_s28, %s731_s28, %s732_s30  }
 0x118 PF: > { %p625_p3 = scmp.ge.s32.totalorder %s726_s18, 2  ;;  %s510_s6 = sand.u32 1, %s714_s15  }
 0x119   : > { %s511_s25 = scalar_lea.sflag [#allocation3], %s510_s6 }
 0x11a   : > { %p622_p4 = pnand %p625_p3, %p800_p6 }
 0x11c   : > { %709 = dma.done.wait (!%p622_p4), %s511_s25, 1280  }
 0x11d   : > { %711 = vsyncadd (!%p622_p4), %s511_s25, 4294966016  ;;  %p14_p5 = scmp.ge.s32.totalorder %s783_s21, 6   ;;  %s921_s15 = smov %s718_s16 }
 0x11e   : > { %s922_s16 = smov %s722_s17  ;;  %s923_s17 = smov %s794_s24 }
 0x11f   : > { %s924_s18 = smov %s783_s21  ;;  %16 = sbr.rel (!%p14_p5) target bundleno = 3 (0x3), region = 71 }
 0x126   :  { %516 = vsyncpa [#allocation3], 1 }
 0x127   :  { %518 = vsyncpa [#allocation3 + $0x1], 1 }

</bundles_post_ra>
